<compile_context>
chip_gen: v5e
topology: v5e:2x2
jax: 0.10.0
libtpu: 0.0.40
codegen_flags: <defaults>
</compile_context>

<pallas_src>
import jax
import jax.numpy as jnp
from jax.experimental import pallas as pl
from jax.experimental.pallas import tpu as pltpu


def _make_maxpool_kernel(seq_len, padding_idx, nclasses):
    """Kernel closed over static config.

    Ref shapes per grid step (one batch tile of `tb` rows):
      ids_ref : (tb, seq_len)  int32  token ids, batch-major
      emb_ref : (voc,  edim)   f32    embedding table
      w1_ref  : (hdim, edim)   f32    nn.Linear(edim, hdim) weight (PyTorch layout)
      b1_ref  : (1,    hdim)   f32
      w2_ref  : (npad, hdim)   f32    nn.Linear(hdim, nclasses) weight, zero-padded
      b2_ref  : (1,    npad)   f32
      o_ref   : (tb,   npad)   f32    log-probs (first `nclasses` lanes valid)
    """

    def kernel(ids_ref, emb_ref, w1_ref, b1_ref, w2_ref, b2_ref, o_ref):
        tb = ids_ref.shape[0]
        voc = emb_ref.shape[0]
        hdim = w1_ref.shape[0]
        npad = w2_ref.shape[0]

        # Hoist constant operands out of the sequence loop.
        table = emb_ref[...]
        w1 = w1_ref[...]
        b1 = b1_ref[...]

        neg_inf = jnp.float32(-jnp.inf)
        h = jnp.full((tb, hdim), neg_inf, dtype=jnp.float32)

        # Max-pool over sequence positions. seq_len is a compile-time constant,
        # so this small loop is fully unrolled; the embedding lookup is done as a
        # one-hot MXU matmul (robust for small vocab; a DMA gather would be used
        # for a large vocabulary).
        for s in range(seq_len):
            ids_s = ids_ref[:, s:s + 1]                                    # (tb, 1)
            onehot = (jax.lax.broadcasted_iota(jnp.int32, (tb, voc), 1)
                      == ids_s).astype(jnp.float32)                        # (tb, voc)
            emb_s = jnp.dot(onehot, table,
                            preferred_element_type=jnp.float32)            # (tb, edim)
            # TODO(synk): dropout on emb_s omitted (eval/inference mode identity).
            aff = jax.lax.dot_general(
                emb_s, w1, (((1,), (1,)), ((), ())),
                preferred_element_type=jnp.float32) + b1                   # (tb, hdim)
            aff = jnp.where(ids_s == padding_idx, neg_inf, aff)            # masked_fill
            h = jnp.maximum(h, aff)

        # Classifier head on the padded (lane-dense) class dim + log-softmax.
        logits = jax.lax.dot_general(
            h, w2_ref[...], (((1,), (1,)), ((), ())),
            preferred_element_type=jnp.float32) + b2_ref[...]              # (tb, npad)

        valid = jax.lax.broadcasted_iota(jnp.int32, (tb, npad), 1) < nclasses
        logits = jnp.where(valid, logits, neg_inf)
        m = jnp.max(logits, axis=-1, keepdims=True)
        e = jnp.where(valid, jnp.exp(logits - m), 0.0)
        lse = jnp.log(jnp.sum(e, axis=-1, keepdims=True))
        o_ref[...] = (logits - m - lse).astype(o_ref.dtype)

    return kernel


def maxpooling_forward(inputs, emb_table, w1, b1, w2, b2, *, padding_idx):
    """inputs: (seq_len, bsz) int token ids.  Params in PyTorch layout:
    emb_table (voc, edim), w1 (hdim, edim), b1 (hdim,), w2 (nclasses, hdim), b2 (nclasses,)."""
    seq_len, bsz = inputs.shape
    voc, edim = emb_table.shape
    hdim = w1.shape[0]
    nclasses = w2.shape[0]

    # Lane-dense classifier head: zero-pad nclasses up to a multiple of 128 so
    # kernel stores are full-lane; slice the padding off after the call.
    npad = max(128, ((nclasses + 127) // 128) * 128)
    w2p = jnp.zeros((npad, hdim), w2.dtype).at[:nclasses, :].set(w2)
    b2p = jnp.zeros((1, npad), b2.dtype).at[0, :nclasses].set(b2)
    b1r = b1.reshape(1, hdim)

    # Batch-major ids so the grid tiles the batch dim (tiny int transpose only;
    # the large weight matrices stay in their native PyTorch layout).
    ids_bt = inputs.T.astype(jnp.int32)                                    # (bsz, seq_len)

    # Batch tile: large multiple of 8 sublanes when divisible, else whole batch.
    if bsz % 128 == 0:
        tb = 128
    elif bsz % 8 == 0:
        tb = 8
    else:
        tb = bsz
    grid = (bsz // tb,)

    kernel = _make_maxpool_kernel(seq_len, int(padding_idx), nclasses)

    cost = pl.CostEstimate(
        flops=2 * bsz * seq_len * (voc * edim + edim * hdim) + 2 * bsz * hdim * npad,
        transcendentals=bsz * npad,
        bytes_accessed=4 * (bsz * seq_len + voc * edim + hdim * edim + hdim
                            + npad * hdim + npad + bsz * npad),
    )

    out_padded = pl.pallas_call(
        kernel,
        out_shape=jax.ShapeDtypeStruct((bsz, npad), jnp.float32),
        grid=grid,
        in_specs=[
            pl.BlockSpec((tb, seq_len), lambda i: (i, 0)),   # ids (batch tiled)
            pl.BlockSpec((voc, edim), lambda i: (0, 0)),     # embedding table
            pl.BlockSpec((hdim, edim), lambda i: (0, 0)),    # W1
            pl.BlockSpec((1, hdim), lambda i: (0, 0)),       # b1
            pl.BlockSpec((npad, hdim), lambda i: (0, 0)),    # W2 (padded)
            pl.BlockSpec((1, npad), lambda i: (0, 0)),       # b2 (padded)
        ],
        out_specs=pl.BlockSpec((tb, npad), lambda i: (i, 0)),
        compiler_params=pltpu.CompilerParams(
            dimension_semantics=("parallel",)),
        cost_estimate=cost,
    )(ids_bt, emb_table, w1, b1r, w2p, b2p)

    return out_padded[:, :nclasses]


if __name__ == "__main__":
    # Small shapes consistent with the module.
    voc_size, edim, hdim, nclasses = 128, 64, 128, 16
    seq_len, bsz, padding_idx = 8, 16, 0

    key = jax.random.PRNGKey(0)
    k_emb, k_w1, k_b1, k_w2, k_b2, k_in = jax.random.split(key, 6)

    emb_table = jax.random.normal(k_emb, (voc_size, edim), dtype=jnp.float32)
    emb_table = emb_table.at[padding_idx].set(0.0)   # nn.Embedding padding_idx row

    bound1 = 1.0 / (edim ** 0.5)
    w1 = jax.random.uniform(k_w1, (hdim, edim), minval=-bound1, maxval=bound1,
                            dtype=jnp.float32)
    b1 = jax.random.uniform(k_b1, (hdim,), minval=-bound1, maxval=bound1,
                            dtype=jnp.float32)
    bound2 = 1.0 / (hdim ** 0.5)
    w2 = jax.random.uniform(k_w2, (nclasses, hdim), minval=-bound2, maxval=bound2,
                            dtype=jnp.float32)
    b2 = jax.random.uniform(k_b2, (nclasses,), minval=-bound2, maxval=bound2,
                            dtype=jnp.float32)

    inputs = jax.random.randint(k_in, (seq_len, bsz), minval=1, maxval=voc_size,
                                dtype=jnp.int32)
    # Pad the tail of the first half of the batch (every column keeps real tokens).
    inputs = inputs.at[seq_len // 2:, : bsz // 2].set(padding_idx)

    out = maxpooling_forward(inputs, emb_table, w1, b1, w2, b2,
                             padding_idx=padding_idx)
    jax.block_until_ready(out)

    # Pure-JAX reference of the PyTorch forward (eval mode: dropout = identity).
    embs = emb_table[inputs]                                     # (S, B, E)
    aff = embs @ w1.T + b1                                       # (S, B, H)
    aff = jnp.where((inputs == padding_idx)[:, :, None], -jnp.inf, aff)
    h_ref = aff.max(axis=0)                                      # (B, H)
    ref = jax.nn.log_softmax(h_ref @ w2.T + b2, axis=-1)         # (B, nclasses)

    assert out.shape == (bsz, nclasses)
    assert jnp.allclose(out, ref, atol=2e-2, rtol=2e-2), float(
        jnp.max(jnp.abs(out - ref)))
    print("KERNEL_OK")
</pallas_src>

<mosaic_0001>
module attributes {stable_mosaic.version = 11 : i64} {
  func.func @kernel(%arg0: i32, %arg1: memref<8x8xi32, #tpu.memory_space<vmem>>, %arg2: memref<128x64xf32, #tpu.memory_space<vmem>>, %arg3: memref<128x64xf32, #tpu.memory_space<vmem>>, %arg4: memref<1x128xf32, #tpu.memory_space<vmem>>, %arg5: memref<128x128xf32, #tpu.memory_space<vmem>>, %arg6: memref<1x128xf32, #tpu.memory_space<vmem>>, %arg7: memref<8x128xf32, #tpu.memory_space<vmem>>) attributes {dimension_semantics = [#tpu.dimension_semantics<parallel>], iteration_bounds = array<i64: 2>, scalar_prefetch = 0 : i64, scratch_operands = 0 : i64, tpu.core_type = #tpu.core_type<tc>, window_params = [{transform_indices = @transform_0, window_bounds = array<i64: 8, 8>}, {pipeline_mode = #tpu.pipeline_mode<synchronous>, transform_indices = @transform_1, window_bounds = array<i64: 128, 64>}, {pipeline_mode = #tpu.pipeline_mode<synchronous>, transform_indices = @transform_2, window_bounds = array<i64: 128, 64>}, {pipeline_mode = #tpu.pipeline_mode<synchronous>, transform_indices = @transform_3, window_bounds = array<i64: 1, 128>}, {pipeline_mode = #tpu.pipeline_mode<synchronous>, transform_indices = @transform_4, window_bounds = array<i64: 128, 128>}, {pipeline_mode = #tpu.pipeline_mode<synchronous>, transform_indices = @transform_5, window_bounds = array<i64: 1, 128>}, {transform_indices = @transform_6, window_bounds = array<i64: 8, 128>}]} {
    %c0 = arith.constant 0 : index
    %c0_0 = arith.constant 0 : index
    %0 = vector.load %arg2[%c0, %c0_0] : memref<128x64xf32, #tpu.memory_space<vmem>>, vector<128x64xf32>
    %c0_1 = arith.constant 0 : index
    %c0_2 = arith.constant 0 : index
    %1 = vector.load %arg3[%c0_1, %c0_2] : memref<128x64xf32, #tpu.memory_space<vmem>>, vector<128x64xf32>
    %c0_3 = arith.constant 0 : index
    %c0_4 = arith.constant 0 : index
    %2 = vector.load %arg4[%c0_3, %c0_4] : memref<1x128xf32, #tpu.memory_space<vmem>>, vector<1x128xf32>
    %cst = arith.constant 0xFF800000 : f32
    %3 = vector.broadcast %cst : f32 to vector<8x128xf32>
    %c0_5 = arith.constant 0 : index
    %c0_6 = arith.constant 0 : index
    %4 = vector.load %arg1[%c0_5, %c0_6] : memref<8x8xi32, #tpu.memory_space<vmem>>, vector<8x1xi32>
    %5 = tpu.iota {dimensions = array<i32: 1>} : vector<8x128xi32>
    %6 = vector.broadcast %4 : vector<8x1xi32> to vector<8x128xi32>
    %7 = arith.cmpi eq, %5, %6 : vector<8x128xi32>
    %8 = arith.extui %7 : vector<8x128xi1> to vector<8x128xi32>
    %9 = arith.sitofp %8 : vector<8x128xi32> to vector<8x128xf32>
    %cst_7 = arith.constant dense<0.000000e+00> : vector<8x64xf32>
    %10 = tpu.matmul %9, %0, %cst_7 {dimension_numbers = #tpu.dot_dimension_numbers<[1], [0], [0], [1], [0, 0, 1, 1], [], []>} : vector<8x128xf32>, vector<128x64xf32>, vector<8x64xf32> -> vector<8x64xf32>
    %cst_8 = arith.constant dense<0.000000e+00> : vector<8x128xf32>
    %11 = tpu.matmul %10, %1, %cst_8 {dimension_numbers = #tpu.dot_dimension_numbers<[1], [1], [0], [0], [0, 0, 1, 0], [], []>} : vector<8x64xf32>, vector<128x64xf32>, vector<8x128xf32> -> vector<8x128xf32>
    %12 = vector.broadcast %2 : vector<1x128xf32> to vector<8x128xf32>
    %13 = arith.addf %11, %12 : vector<8x128xf32>
    %c0_i32 = arith.constant 0 : i32
    %14 = vector.broadcast %c0_i32 : i32 to vector<8x1xi32>
    %15 = arith.cmpi eq, %4, %14 : vector<8x1xi32>
    %cst_9 = arith.constant 0xFF800000 : f32
    %16 = vector.shape_cast %15 : vector<8x1xi1> to vector<8x1xi1>
    %17 = vector.broadcast %16 : vector<8x1xi1> to vector<8x128xi1>
    %18 = vector.broadcast %cst_9 : f32 to vector<8x128xf32>
    %19 = arith.select %17, %18, %13 : vector<8x128xi1>, vector<8x128xf32>
    %20 = arith.maximumf %3, %19 : vector<8x128xf32>
    %c0_10 = arith.constant 0 : index
    %c1 = arith.constant 1 : index
    %21 = vector.load %arg1[%c0_10, %c1] : memref<8x8xi32, #tpu.memory_space<vmem>>, vector<8x1xi32>
    %22 = tpu.iota {dimensions = array<i32: 1>} : vector<8x128xi32>
    %23 = vector.broadcast %21 : vector<8x1xi32> to vector<8x128xi32>
    %24 = arith.cmpi eq, %22, %23 : vector<8x128xi32>
    %25 = arith.extui %24 : vector<8x128xi1> to vector<8x128xi32>
    %26 = arith.sitofp %25 : vector<8x128xi32> to vector<8x128xf32>
    %cst_11 = arith.constant dense<0.000000e+00> : vector<8x64xf32>
    %27 = tpu.matmul %26, %0, %cst_11 {dimension_numbers = #tpu.dot_dimension_numbers<[1], [0], [0], [1], [0, 0, 1, 1], [], []>} : vector<8x128xf32>, vector<128x64xf32>, vector<8x64xf32> -> vector<8x64xf32>
    %cst_12 = arith.constant dense<0.000000e+00> : vector<8x128xf32>
    %28 = tpu.matmul %27, %1, %cst_12 {dimension_numbers = #tpu.dot_dimension_numbers<[1], [1], [0], [0], [0, 0, 1, 0], [], []>} : vector<8x64xf32>, vector<128x64xf32>, vector<8x128xf32> -> vector<8x128xf32>
    %29 = vector.broadcast %2 : vector<1x128xf32> to vector<8x128xf32>
    %30 = arith.addf %28, %29 : vector<8x128xf32>
    %c0_i32_13 = arith.constant 0 : i32
    %31 = vector.broadcast %c0_i32_13 : i32 to vector<8x1xi32>
    %32 = arith.cmpi eq, %21, %31 : vector<8x1xi32>
    %cst_14 = arith.constant 0xFF800000 : f32
    %33 = vector.shape_cast %32 : vector<8x1xi1> to vector<8x1xi1>
    %34 = vector.broadcast %33 : vector<8x1xi1> to vector<8x128xi1>
    %35 = vector.broadcast %cst_14 : f32 to vector<8x128xf32>
    %36 = arith.select %34, %35, %30 : vector<8x128xi1>, vector<8x128xf32>
    %37 = arith.maximumf %20, %36 : vector<8x128xf32>
    %c0_15 = arith.constant 0 : index
    %c2 = arith.constant 2 : index
    %38 = vector.load %arg1[%c0_15, %c2] : memref<8x8xi32, #tpu.memory_space<vmem>>, vector<8x1xi32>
    %39 = tpu.iota {dimensions = array<i32: 1>} : vector<8x128xi32>
    %40 = vector.broadcast %38 : vector<8x1xi32> to vector<8x128xi32>
    %41 = arith.cmpi eq, %39, %40 : vector<8x128xi32>
    %42 = arith.extui %41 : vector<8x128xi1> to vector<8x128xi32>
    %43 = arith.sitofp %42 : vector<8x128xi32> to vector<8x128xf32>
    %cst_16 = arith.constant dense<0.000000e+00> : vector<8x64xf32>
    %44 = tpu.matmul %43, %0, %cst_16 {dimension_numbers = #tpu.dot_dimension_numbers<[1], [0], [0], [1], [0, 0, 1, 1], [], []>} : vector<8x128xf32>, vector<128x64xf32>, vector<8x64xf32> -> vector<8x64xf32>
    %cst_17 = arith.constant dense<0.000000e+00> : vector<8x128xf32>
    %45 = tpu.matmul %44, %1, %cst_17 {dimension_numbers = #tpu.dot_dimension_numbers<[1], [1], [0], [0], [0, 0, 1, 0], [], []>} : vector<8x64xf32>, vector<128x64xf32>, vector<8x128xf32> -> vector<8x128xf32>
    %46 = vector.broadcast %2 : vector<1x128xf32> to vector<8x128xf32>
    %47 = arith.addf %45, %46 : vector<8x128xf32>
    %c0_i32_18 = arith.constant 0 : i32
    %48 = vector.broadcast %c0_i32_18 : i32 to vector<8x1xi32>
    %49 = arith.cmpi eq, %38, %48 : vector<8x1xi32>
    %cst_19 = arith.constant 0xFF800000 : f32
    %50 = vector.shape_cast %49 : vector<8x1xi1> to vector<8x1xi1>
    %51 = vector.broadcast %50 : vector<8x1xi1> to vector<8x128xi1>
    %52 = vector.broadcast %cst_19 : f32 to vector<8x128xf32>
    %53 = arith.select %51, %52, %47 : vector<8x128xi1>, vector<8x128xf32>
    %54 = arith.maximumf %37, %53 : vector<8x128xf32>
    %c0_20 = arith.constant 0 : index
    %c3 = arith.constant 3 : index
    %55 = vector.load %arg1[%c0_20, %c3] : memref<8x8xi32, #tpu.memory_space<vmem>>, vector<8x1xi32>
    %56 = tpu.iota {dimensions = array<i32: 1>} : vector<8x128xi32>
    %57 = vector.broadcast %55 : vector<8x1xi32> to vector<8x128xi32>
    %58 = arith.cmpi eq, %56, %57 : vector<8x128xi32>
    %59 = arith.extui %58 : vector<8x128xi1> to vector<8x128xi32>
    %60 = arith.sitofp %59 : vector<8x128xi32> to vector<8x128xf32>
    %cst_21 = arith.constant dense<0.000000e+00> : vector<8x64xf32>
    %61 = tpu.matmul %60, %0, %cst_21 {dimension_numbers = #tpu.dot_dimension_numbers<[1], [0], [0], [1], [0, 0, 1, 1], [], []>} : vector<8x128xf32>, vector<128x64xf32>, vector<8x64xf32> -> vector<8x64xf32>
    %cst_22 = arith.constant dense<0.000000e+00> : vector<8x128xf32>
    %62 = tpu.matmul %61, %1, %cst_22 {dimension_numbers = #tpu.dot_dimension_numbers<[1], [1], [0], [0], [0, 0, 1, 0], [], []>} : vector<8x64xf32>, vector<128x64xf32>, vector<8x128xf32> -> vector<8x128xf32>
    %63 = vector.broadcast %2 : vector<1x128xf32> to vector<8x128xf32>
    %64 = arith.addf %62, %63 : vector<8x128xf32>
    %c0_i32_23 = arith.constant 0 : i32
    %65 = vector.broadcast %c0_i32_23 : i32 to vector<8x1xi32>
    %66 = arith.cmpi eq, %55, %65 : vector<8x1xi32>
    %cst_24 = arith.constant 0xFF800000 : f32
    %67 = vector.shape_cast %66 : vector<8x1xi1> to vector<8x1xi1>
    %68 = vector.broadcast %67 : vector<8x1xi1> to vector<8x128xi1>
    %69 = vector.broadcast %cst_24 : f32 to vector<8x128xf32>
    %70 = arith.select %68, %69, %64 : vector<8x128xi1>, vector<8x128xf32>
    %71 = arith.maximumf %54, %70 : vector<8x128xf32>
    %c0_25 = arith.constant 0 : index
    %c4 = arith.constant 4 : index
    %72 = vector.load %arg1[%c0_25, %c4] : memref<8x8xi32, #tpu.memory_space<vmem>>, vector<8x1xi32>
    %73 = tpu.iota {dimensions = array<i32: 1>} : vector<8x128xi32>
    %74 = vector.broadcast %72 : vector<8x1xi32> to vector<8x128xi32>
    %75 = arith.cmpi eq, %73, %74 : vector<8x128xi32>
    %76 = arith.extui %75 : vector<8x128xi1> to vector<8x128xi32>
    %77 = arith.sitofp %76 : vector<8x128xi32> to vector<8x128xf32>
    %cst_26 = arith.constant dense<0.000000e+00> : vector<8x64xf32>
    %78 = tpu.matmul %77, %0, %cst_26 {dimension_numbers = #tpu.dot_dimension_numbers<[1], [0], [0], [1], [0, 0, 1, 1], [], []>} : vector<8x128xf32>, vector<128x64xf32>, vector<8x64xf32> -> vector<8x64xf32>
    %cst_27 = arith.constant dense<0.000000e+00> : vector<8x128xf32>
    %79 = tpu.matmul %78, %1, %cst_27 {dimension_numbers = #tpu.dot_dimension_numbers<[1], [1], [0], [0], [0, 0, 1, 0], [], []>} : vector<8x64xf32>, vector<128x64xf32>, vector<8x128xf32> -> vector<8x128xf32>
    %80 = vector.broadcast %2 : vector<1x128xf32> to vector<8x128xf32>
    %81 = arith.addf %79, %80 : vector<8x128xf32>
    %c0_i32_28 = arith.constant 0 : i32
    %82 = vector.broadcast %c0_i32_28 : i32 to vector<8x1xi32>
    %83 = arith.cmpi eq, %72, %82 : vector<8x1xi32>
    %cst_29 = arith.constant 0xFF800000 : f32
    %84 = vector.shape_cast %83 : vector<8x1xi1> to vector<8x1xi1>
    %85 = vector.broadcast %84 : vector<8x1xi1> to vector<8x128xi1>
    %86 = vector.broadcast %cst_29 : f32 to vector<8x128xf32>
    %87 = arith.select %85, %86, %81 : vector<8x128xi1>, vector<8x128xf32>
    %88 = arith.maximumf %71, %87 : vector<8x128xf32>
    %c0_30 = arith.constant 0 : index
    %c5 = arith.constant 5 : index
    %89 = vector.load %arg1[%c0_30, %c5] : memref<8x8xi32, #tpu.memory_space<vmem>>, vector<8x1xi32>
    %90 = tpu.iota {dimensions = array<i32: 1>} : vector<8x128xi32>
    %91 = vector.broadcast %89 : vector<8x1xi32> to vector<8x128xi32>
    %92 = arith.cmpi eq, %90, %91 : vector<8x128xi32>
    %93 = arith.extui %92 : vector<8x128xi1> to vector<8x128xi32>
    %94 = arith.sitofp %93 : vector<8x128xi32> to vector<8x128xf32>
    %cst_31 = arith.constant dense<0.000000e+00> : vector<8x64xf32>
    %95 = tpu.matmul %94, %0, %cst_31 {dimension_numbers = #tpu.dot_dimension_numbers<[1], [0], [0], [1], [0, 0, 1, 1], [], []>} : vector<8x128xf32>, vector<128x64xf32>, vector<8x64xf32> -> vector<8x64xf32>
    %cst_32 = arith.constant dense<0.000000e+00> : vector<8x128xf32>
    %96 = tpu.matmul %95, %1, %cst_32 {dimension_numbers = #tpu.dot_dimension_numbers<[1], [1], [0], [0], [0, 0, 1, 0], [], []>} : vector<8x64xf32>, vector<128x64xf32>, vector<8x128xf32> -> vector<8x128xf32>
    %97 = vector.broadcast %2 : vector<1x128xf32> to vector<8x128xf32>
    %98 = arith.addf %96, %97 : vector<8x128xf32>
    %c0_i32_33 = arith.constant 0 : i32
    %99 = vector.broadcast %c0_i32_33 : i32 to vector<8x1xi32>
    %100 = arith.cmpi eq, %89, %99 : vector<8x1xi32>
    %cst_34 = arith.constant 0xFF800000 : f32
    %101 = vector.shape_cast %100 : vector<8x1xi1> to vector<8x1xi1>
    %102 = vector.broadcast %101 : vector<8x1xi1> to vector<8x128xi1>
    %103 = vector.broadcast %cst_34 : f32 to vector<8x128xf32>
    %104 = arith.select %102, %103, %98 : vector<8x128xi1>, vector<8x128xf32>
    %105 = arith.maximumf %88, %104 : vector<8x128xf32>
    %c0_35 = arith.constant 0 : index
    %c6 = arith.constant 6 : index
    %106 = vector.load %arg1[%c0_35, %c6] : memref<8x8xi32, #tpu.memory_space<vmem>>, vector<8x1xi32>
    %107 = tpu.iota {dimensions = array<i32: 1>} : vector<8x128xi32>
    %108 = vector.broadcast %106 : vector<8x1xi32> to vector<8x128xi32>
    %109 = arith.cmpi eq, %107, %108 : vector<8x128xi32>
    %110 = arith.extui %109 : vector<8x128xi1> to vector<8x128xi32>
    %111 = arith.sitofp %110 : vector<8x128xi32> to vector<8x128xf32>
    %cst_36 = arith.constant dense<0.000000e+00> : vector<8x64xf32>
    %112 = tpu.matmul %111, %0, %cst_36 {dimension_numbers = #tpu.dot_dimension_numbers<[1], [0], [0], [1], [0, 0, 1, 1], [], []>} : vector<8x128xf32>, vector<128x64xf32>, vector<8x64xf32> -> vector<8x64xf32>
    %cst_37 = arith.constant dense<0.000000e+00> : vector<8x128xf32>
    %113 = tpu.matmul %112, %1, %cst_37 {dimension_numbers = #tpu.dot_dimension_numbers<[1], [1], [0], [0], [0, 0, 1, 0], [], []>} : vector<8x64xf32>, vector<128x64xf32>, vector<8x128xf32> -> vector<8x128xf32>
    %114 = vector.broadcast %2 : vector<1x128xf32> to vector<8x128xf32>
    %115 = arith.addf %113, %114 : vector<8x128xf32>
    %c0_i32_38 = arith.constant 0 : i32
    %116 = vector.broadcast %c0_i32_38 : i32 to vector<8x1xi32>
    %117 = arith.cmpi eq, %106, %116 : vector<8x1xi32>
    %cst_39 = arith.constant 0xFF800000 : f32
    %118 = vector.shape_cast %117 : vector<8x1xi1> to vector<8x1xi1>
    %119 = vector.broadcast %118 : vector<8x1xi1> to vector<8x128xi1>
    %120 = vector.broadcast %cst_39 : f32 to vector<8x128xf32>
    %121 = arith.select %119, %120, %115 : vector<8x128xi1>, vector<8x128xf32>
    %122 = arith.maximumf %105, %121 : vector<8x128xf32>
    %c0_40 = arith.constant 0 : index
    %c7 = arith.constant 7 : index
    %123 = vector.load %arg1[%c0_40, %c7] : memref<8x8xi32, #tpu.memory_space<vmem>>, vector<8x1xi32>
    %124 = tpu.iota {dimensions = array<i32: 1>} : vector<8x128xi32>
    %125 = vector.broadcast %123 : vector<8x1xi32> to vector<8x128xi32>
    %126 = arith.cmpi eq, %124, %125 : vector<8x128xi32>
    %127 = arith.extui %126 : vector<8x128xi1> to vector<8x128xi32>
    %128 = arith.sitofp %127 : vector<8x128xi32> to vector<8x128xf32>
    %cst_41 = arith.constant dense<0.000000e+00> : vector<8x64xf32>
    %129 = tpu.matmul %128, %0, %cst_41 {dimension_numbers = #tpu.dot_dimension_numbers<[1], [0], [0], [1], [0, 0, 1, 1], [], []>} : vector<8x128xf32>, vector<128x64xf32>, vector<8x64xf32> -> vector<8x64xf32>
    %cst_42 = arith.constant dense<0.000000e+00> : vector<8x128xf32>
    %130 = tpu.matmul %129, %1, %cst_42 {dimension_numbers = #tpu.dot_dimension_numbers<[1], [1], [0], [0], [0, 0, 1, 0], [], []>} : vector<8x64xf32>, vector<128x64xf32>, vector<8x128xf32> -> vector<8x128xf32>
    %131 = vector.broadcast %2 : vector<1x128xf32> to vector<8x128xf32>
    %132 = arith.addf %130, %131 : vector<8x128xf32>
    %c0_i32_43 = arith.constant 0 : i32
    %133 = vector.broadcast %c0_i32_43 : i32 to vector<8x1xi32>
    %134 = arith.cmpi eq, %123, %133 : vector<8x1xi32>
    %cst_44 = arith.constant 0xFF800000 : f32
    %135 = vector.shape_cast %134 : vector<8x1xi1> to vector<8x1xi1>
    %136 = vector.broadcast %135 : vector<8x1xi1> to vector<8x128xi1>
    %137 = vector.broadcast %cst_44 : f32 to vector<8x128xf32>
    %138 = arith.select %136, %137, %132 : vector<8x128xi1>, vector<8x128xf32>
    %139 = arith.maximumf %122, %138 : vector<8x128xf32>
    %c0_45 = arith.constant 0 : index
    %c0_46 = arith.constant 0 : index
    %140 = vector.load %arg5[%c0_45, %c0_46] : memref<128x128xf32, #tpu.memory_space<vmem>>, vector<128x128xf32>
    %cst_47 = arith.constant dense<0.000000e+00> : vector<8x128xf32>
    %141 = tpu.matmul %139, %140, %cst_47 {dimension_numbers = #tpu.dot_dimension_numbers<[1], [1], [0], [0], [0, 0, 1, 0], [], []>} : vector<8x128xf32>, vector<128x128xf32>, vector<8x128xf32> -> vector<8x128xf32>
    %c0_48 = arith.constant 0 : index
    %c0_49 = arith.constant 0 : index
    %142 = vector.load %arg6[%c0_48, %c0_49] : memref<1x128xf32, #tpu.memory_space<vmem>>, vector<1x128xf32>
    %143 = vector.broadcast %142 : vector<1x128xf32> to vector<8x128xf32>
    %144 = arith.addf %141, %143 : vector<8x128xf32>
    %145 = tpu.iota {dimensions = array<i32: 1>} : vector<8x128xi32>
    %c16_i32 = arith.constant 16 : i32
    %146 = vector.broadcast %c16_i32 : i32 to vector<8x128xi32>
    %147 = arith.cmpi slt, %145, %146 : vector<8x128xi32>
    %cst_50 = arith.constant 0xFF800000 : f32
    %148 = vector.broadcast %cst_50 : f32 to vector<8x128xf32>
    %149 = arith.select %147, %144, %148 : vector<8x128xi1>, vector<8x128xf32>
    %cst_51 = arith.constant dense<0xFF800000> : vector<8xf32>
    %150 = vector.multi_reduction <maximumf>, %149, %cst_51 [1] : vector<8x128xf32> to vector<8xf32>
    %151 = vector.shape_cast %150 : vector<8xf32> to vector<8x1xf32>
    %152 = vector.broadcast %151 : vector<8x1xf32> to vector<8x128xf32>
    %153 = arith.subf %149, %152 : vector<8x128xf32>
    %154 = math.exp %153 : vector<8x128xf32>
    %cst_52 = arith.constant 0.000000e+00 : f32
    %155 = vector.broadcast %cst_52 : f32 to vector<8x128xf32>
    %156 = arith.select %147, %154, %155 : vector<8x128xi1>, vector<8x128xf32>
    %cst_53 = arith.constant dense<0.000000e+00> : vector<8xf32>
    %157 = vector.multi_reduction <add>, %156, %cst_53 [1] : vector<8x128xf32> to vector<8xf32>
    %158 = vector.shape_cast %157 : vector<8xf32> to vector<8x1xf32>
    %159 = math.log %158 : vector<8x1xf32>
    %160 = vector.broadcast %151 : vector<8x1xf32> to vector<8x128xf32>
    %161 = arith.subf %149, %160 : vector<8x128xf32>
    %162 = vector.broadcast %159 : vector<8x1xf32> to vector<8x128xf32>
    %163 = arith.subf %161, %162 : vector<8x128xf32>
    %c0_54 = arith.constant 0 : index
    %c0_55 = arith.constant 0 : index
    %164 = vector.load %arg7[%c0_54, %c0_55] : memref<8x128xf32, #tpu.memory_space<vmem>>, vector<8x128xf32>
    tpu.vector_store %arg7[%c0_54, %c0_55], %163 {strides = array<i32>} : memref<8x128xf32, #tpu.memory_space<vmem>>, vector<8x128xf32>,
    return
  }
  func.func @transform_0(%arg0: i32) -> (i32, i32) {
    %c0_i32 = arith.constant 0 : i32
    %c0_i32_0 = arith.constant 0 : i32
    return %arg0, %c0_i32 : i32, i32
  }
  func.func @transform_1(%arg0: i32) -> (i32, i32) {
    %c0_i32 = arith.constant 0 : i32
    %c0_i32_0 = arith.constant 0 : i32
    %c0_i32_1 = arith.constant 0 : i32
    return %c0_i32, %c0_i32_0 : i32, i32
  }
  func.func @transform_2(%arg0: i32) -> (i32, i32) {
    %c0_i32 = arith.constant 0 : i32
    %c0_i32_0 = arith.constant 0 : i32
    %c0_i32_1 = arith.constant 0 : i32
    return %c0_i32, %c0_i32_0 : i32, i32
  }
  func.func @transform_3(%arg0: i32) -> (i32, i32) {
    %c0_i32 = arith.constant 0 : i32
    %c0_i32_0 = arith.constant 0 : i32
    %c0_i32_1 = arith.constant 0 : i32
    return %c0_i32, %c0_i32_0 : i32, i32
  }
  func.func @transform_4(%arg0: i32) -> (i32, i32) {
    %c0_i32 = arith.constant 0 : i32
    %c0_i32_0 = arith.constant 0 : i32
    %c0_i32_1 = arith.constant 0 : i32
    return %c0_i32, %c0_i32_0 : i32, i32
  }
  func.func @transform_5(%arg0: i32) -> (i32, i32) {
    %c0_i32 = arith.constant 0 : i32
    %c0_i32_0 = arith.constant 0 : i32
    %c0_i32_1 = arith.constant 0 : i32
    return %c0_i32, %c0_i32_0 : i32, i32
  }
  func.func @transform_6(%arg0: i32) -> (i32, i32) {
    %c0_i32 = arith.constant 0 : i32
    %c0_i32_0 = arith.constant 0 : i32
    return %arg0, %c0_i32 : i32, i32
  }
}

</mosaic_0001>

<bundles_post_ra>
// kernel: tpu_custom_call.1
= control target key start
LH: loop header
LB: loop body
LE: loop exit
PB: predicated region body
PF: predicated region fallthrough
CT: control target
= control target key end

     0   :  { %11 = vsyncpa [#allocation3], 0  ;;  %s1994_s0 = inlined_call_operand.vmem [shape: s32[16,8], index: 0, kind: input, shape index: {}]   ;;  %s1995_s1 = inlined_call_operand.vmem [shape: f32[128,64], index: 1, kind: input, shape index: {}]   ;;  %s1996_s2 = inlined_call_operand.vmem [shape: f32[128,64], index: 2, kind: input, shape index: {}]   ;;  %s1997_s3 = inlined_call_operand.vmem [shape: f32[1,128], index: 3, kind: input, shape index: {}]   ;;  %s1998_s4 = inlined_call_operand.vmem [shape: f32[128,128], index: 4, kind: input, shape index: {}]   ;;  %s1999_s5 = inlined_call_operand.vmem [shape: f32[1,128], index: 5, kind: input, shape index: {}]   ;;  %s2000_s6 = inlined_call_operand.hbm [shape: f32[16,128], index: 6, kind: output, shape index: {}]  }
   0x1   :  { %13 = vsyncpa [#allocation3 + $0x1], 0  ;;  %s1245_s21 = smov 0   ;;  %s1247_s22 = smov 0  }
   0x2   :  { %s1249_s23 = smov 0   ;;  %s1251_s24 = smov 0  }
   0x3 LB: > { %s1266_s25 = sadd.s32 4294967295, %s1199_s24   ;;  %s905_s26 = sadd.s32 4294967294, %s1199_s24   ;;  %s1199_s24 = sphi %s1251_s24, %s2006_s24   ;;  %s1195_s23 = sphi %s1249_s23, %s2005_s23   ;;  %s1191_s22 = sphi %s1247_s22, %s2004_s22   ;;  %s1187_s21 = sphi %s1245_s21, %s2003_s21  }
   0x4   : > { %s1270_s27 = sadd.s32 1, %s1199_s24   ;;  %s157_s28 = sadd.s32 1, %s1195_s23 }
   0x5   : > { %s154_s29 = ssub.s32 %s1199_s24, %s1270_s27  ;;  %p167_p0 = scmp.ne.s32.totalorder %s1195_s23, %s1191_s22 }
   0x6   : > { %p155_p1 = scmp.eq.s32.totalorder %s154_s29, 0  ;;  %p168_p2 = scmp.eq.s32.totalorder %s1266_s25, 1 }
   0x7   : > { %p173_p3 = scmp.ne.s32.totalorder %s1191_s22, %s1187_s21  ;;  %p174_p4 = scmp.eq.s32.totalorder %s905_s26, 1 }
   0x8   : > { %s1281_s30 = scalar_select %p155_p1, %s1195_s23, %s157_s28  }
   0x9   : > { %p1283_p5 = por %p168_p2, %p167_p0  ;;  %p1287_p6 = por %p174_p4, %p173_p3 }
   0xa   : > { %p908_p7 = scmp.ge.s32.totalorder %s1199_s24, 1  ;;  %p214_p8 = scmp.lt.s32.totalorder %s1199_s24, 3 }
   0xc   : > { %p215_p9 = pnand %p908_p7, %p214_p8 }
   0xd   : > { %p243_p10 = scmp.lt.s32.totalorder (!%p215_p9), %s1266_s25, 1  ;;  %s240_s9 = sand.u32 (!%p215_p9), 1, %s1191_s22  }
   0xe   : > { %218 = sbr.rel (%p215_p9) target bundleno = 1070 (0x42e), region = 44  ;;  %s909_s10 = sshll.u32 (!%p215_p9), %s240_s9, 3 }
   0xf   : > { %s1064_s11 = sshll.u32 (!%p215_p9), %s1266_s25, 3  ;;  %s242_s15 = scalar_lea.vmem (!%p215_p9), [#allocation2], %s909_s10 }
  0x10   : > { %s841_s14 = scalar_lea.hbm (!%p215_p9), %s2000_s6, %s1064_s11  ;;  %s831_s18 = scalar_lea.sflag (!%p215_p9), [#allocation3], %s240_s9 }
  0x11   : > { %s845_s17 = sshll.u32 (!%p215_p9), %s841_s14, 4  ;;  %s1157_s28 = scalar_lea.hbm (!%p215_p9), %s2000_s6, 16  ;;  %s846_s17 = int_to_ptr.hbm [resolvable:$true] %s845_s17 }
  0x13   : > { %v1297_v0 = vld [vmem:[%s1995_s1 + $0x78] sm:$0xff]  ;;  %v1201_v1 = vmov 1   ;;  %v1202_v2 = vmov 2   ;;  %v1304_v3 = vld [vmem:[%s1995_s1 + $0x70] sm:$0xff]  ;;  %s244_s13 = scalar_select %p243_p10, %s1266_s25, 1  ;;  %v1312_v4 = vld [vmem:[%s1995_s1 + $0x68] sm:$0xff]  ;;  %v281_v23 = vlaneseq }
  0x14   : > { %1115 = vset.pattern.permute.xlu0 %v1201_v1  ;;  %1117 = vset.pattern.permute.xlu1 %v1202_v2  ;;  %v1322_v5 = vld [vmem:[%s1995_s1 + $0x60] sm:$0xff]  ;;  %v1333_v7 = vld [vmem:[%s1995_s1 + $0x58] sm:$0xff]  ;;  %v1340_v8 = vld [vmem:[%s1995_s1 + $0x50] sm:$0xff]  ;;  %v1203_v11 = vmov 0   ;;  %v1204_v12 = vmov 3   ;;  %vm312_vm1 = vcmask 523264  }
  0x15   : > { %289 = vmatpush.msra.mxu0 %v1297_v0  ;;  %397 = vmatpush.msra.mxu2 %v1297_v0  ;;  %s910_s16 = sshll.u32 %s244_s13, 3  ;;  %v1347_v9 = vld [vmem:[%s1995_s1 + $0x48] sm:$0xff]  ;;  %v1355_v10 = vld [vmem:[%s1995_s1 + $0x40] sm:$0xff]  ;;  %v1363_v13 = vld [vmem:[%s1995_s1 + $0x38] sm:$0xff]  ;;  %v1461_v25 = vand.u32 127, %v281_v23  ;;  %v1205_v28 = vmov 1.0  }
  0x16   : > { %s246_s19 = scalar_lea.vmem %s1994_s0, %s910_s16  ;;  %v1371_v14 = vld [vmem:[%s1995_s1 + $0x30] sm:$0xff]  ;;  %v1378_v15 = vld [vmem:[%s1995_s1 + $0x28] sm:$0xff]  ;;  %v1387_v17 = vld [vmem:[%s1995_s1 + $0x20] sm:$0xff]  ;;  %v1206_v35 = vmov 4   ;;  %v1207_v36 = vmov 6   ;;  %v1208_v39 = vmov 5  }
  0x17   : > { %290 = vmatpush.msra.mxu0 %v1304_v3  ;;  %398 = vmatpush.msra.mxu2 %v1304_v3  ;;  %v1324_v6 = vld [vmem:[%s246_s19] sm:$0xff]  ;;  %v1394_v18 = vld [vmem:[%s1995_s1 + $0x18] sm:$0xff]  ;;  %v1402_v19 = vld [vmem:[%s1995_s1 + $0x10] sm:$0xff]  ;;  %v1209_v52 = vmov 7   ;;  %s843_s16 = sshll.u32 %s242_s15, 4  ;;  %s1151_s19 = sshra.s32 %s846_s17, 4  ;;  %s844_s16 = int_to_ptr.vmem [resolvable:$true] %s843_s16  ;;  %s1152_s19 = int_to_ptr.hbm [resolvable:$true] %s1151_s19 }
  0x18   : > { %392 = vperm.xlu0 %1115, %v1324_v6   ;;  %447 = vperm.xlu1 %1117, %v1324_v6   ;;  %vm384_vm0 = vcmp.eq.s32.totalorder %v1324_v6, 0  ;;  %v1409_v20 = vld [vmem:[%s1995_s1 + $0x8] sm:$0xff]  ;;  %v1416_v21 = vld [vmem:[%s1995_s1] sm:$0xff]  ;;  %v1442_v22 = vld [vmem:[%s1996_s2 + $0x78] sm:$0xff]  ;;  %s1153_s20 = scalar_lea.hbm %s1152_s19, 8  ;;  %p1158_p0 = scmp.lt.s32.totalorder %s1152_s19, %s2000_s6 }
  0x19   : > { %291 = vmatpush.msra.mxu0 %v1312_v4  ;;  %399 = vmatpush.msra.mxu2 %v1312_v4  ;;  %v1380_v16 = vsel %vm384_vm0, 1, %v1203_v11  ;;  %v1453_v24 = vld [vmem:[%s1996_s2 + $0x70] sm:$0xff]  ;;  %v1466_v26 = vld [vmem:[%s1996_s2 + $0x68] sm:$0xff]  ;;  %v1479_v29 = vld [vmem:[%s1996_s2 + $0x60] sm:$0xff]  ;;  %p1154_p11 = scmp.ne.s32.totalorder %s1152_s19, %s1153_s20  ;;  %p1159_p1 = scmp.lt.s32.totalorder %s1157_s28, %s1153_s20 }
  0x1a   : > { %913 = vmatpush.xpose.msk.msra.mxu1 %vm312_vm1, %v1442_v22  ;;  %932 = vmatpush.xpose.msk.msra.mxu3 %vm312_vm1, %v1442_v22  ;;  %v1490_v30 = vld [vmem:[%s1996_s2 + $0x58] sm:$0xff]  ;;  %v1503_v32 = vld [vmem:[%s1996_s2 + $0x50] sm:$0xff]  ;;  %v1511_v34 = vld [vmem:[%s1996_s2 + $0x48] sm:$0xff] }
  0x1b   : > { %292 = vmatpush.msra.mxu0 %v1322_v5  ;;  %400 = vmatpush.msra.mxu2 %v1322_v5  ;;  %v1526_v37 = vld [vmem:[%s1996_s2 + $0x40] sm:$0xff]  ;;  %v1540_v38 = vld [vmem:[%s1996_s2 + $0x38] sm:$0xff]  ;;  %v1555_v40 = vld [vmem:[%s1996_s2 + $0x30] sm:$0xff]  ;;  %p1155_p12 = pnand %p1154_p11, %p1283_p5  ;;  %p1160_p2 = por %p1159_p1, %p1158_p0 }
  0x1c   : > { %1119 = vset.pattern.permute.xlu2 %v1206_v35  ;;  %v1570_v41 = vld [vmem:[%s1996_s2 + $0x28] sm:$0xff]  ;;  %v1583_v42 = vld [vmem:[%s1996_s2 + $0x20] sm:$0xff]  ;;  %v1597_v44 = vld [vmem:[%s1996_s2 + $0x18] sm:$0xff] }
  0x1d   : > { %293 = vmatpush.msra.mxu0 %v1333_v7  ;;  %401 = vmatpush.msra.mxu2 %v1333_v7  ;;  %v1611_v45 = vld [vmem:[%s1996_s2 + $0x10] sm:$0xff]  ;;  %v1626_v46 = vld [vmem:[%s1996_s2 + $0x8] sm:$0xff]  ;;  %v1641_v47 = vld [vmem:[%s1996_s2] sm:$0xff]  ;;  %p1156_p13 = pneg %p1155_p12 }
  0x1e   : > { %914 = vmatpush.xpose.msk.msra.mxu1 %vm312_vm1, %v1453_v24  ;;  %933 = vmatpush.xpose.msk.msra.mxu3 %vm312_vm1, %v1453_v24  ;;  %v1894_v56 = vld [vmem:[%s1997_s3] ss:$0 sm:$0xff]  ;;  %v790_v23 = vld [vmem:[%s1998_s4 + $0x70] sm:$0xff] }
  0x1f   : > { %294 = vmatpush.msra.mxu0 %v1340_v8  ;;  %402 = vmatpush.msra.mxu2 %v1340_v8  ;;  %p1161_p3 = pnand %p1160_p2, %p1156_p13 }
  0x20   : > { %1116 = vset.pattern.permute.xlu0 %v1203_v11  ;;  %1118 = vset.pattern.permute.xlu1 %v1204_v12 }
  0x21   : > { %295 = vmatpush.msra.mxu0 %v1347_v9  ;;  %403 = vmatpush.msra.mxu2 %v1347_v9 }
  0x22   : > { %284 = vperm.xlu0 %1116, %v1324_v6   ;;  %502 = vperm.xlu1 %1118, %v1324_v6  }
  0x23   : > { %296 = vmatpush.msra.mxu0 %v1355_v10  ;;  %404 = vmatpush.msra.mxu2 %v1355_v10 }
  0x24   : > { %915 = vmatpush.xpose.msk.msra.mxu1 %vm312_vm1, %v1466_v26  ;;  %934 = vmatpush.xpose.msk.msra.mxu3 %vm312_vm1, %v1466_v26 }
  0x25   : > { %297 = vmatpush.msra.mxu0 %v1363_v13  ;;  %405 = vmatpush.msra.mxu2 %v1363_v13 }
  0x26   : > { %557 = vperm.xlu2 %1119, %v1324_v6  }
  0x27   : > { %298 = vmatpush.msra.mxu0 %v1371_v14  ;;  %406 = vmatpush.msra.mxu2 %v1371_v14 }
  0x28   : > { %916 = vmatpush.xpose.msk.msra.mxu1 %vm312_vm1, %v1479_v29  ;;  %935 = vmatpush.xpose.msk.msra.mxu3 %vm312_vm1, %v1479_v29 }
  0x29   : > { %299 = vmatpush.msra.mxu0 %v1378_v15  ;;  %407 = vmatpush.msra.mxu2 %v1378_v15 }
  0x2a   : > { %387 = vperm.xlu0 %1116, %v1380_v16   ;;  %1121 = vset.pattern.permute.xlu1 %v1207_v36 }
  0x2b   : > { %300 = vmatpush.msra.mxu0 %v1387_v17  ;;  %408 = vmatpush.msra.mxu2 %v1387_v17 }
  0x2c   : > { %917 = vmatpush.xpose.msk.msra.mxu1 %vm312_vm1, %v1490_v30  ;;  %936 = vmatpush.xpose.msk.msra.mxu3 %vm312_vm1, %v1490_v30 }
  0x2d   : > { %301 = vmatpush.msra.mxu0 %v1394_v18  ;;  %409 = vmatpush.msra.mxu2 %v1394_v18 }
  0x2e   : > { %667 = vperm.xlu1 %1121, %v1324_v6   ;;  %1120 = vset.pattern.permute.xlu2 %v1208_v39 }
  0x2f   : > { %302 = vmatpush.msra.mxu0 %v1402_v19  ;;  %410 = vmatpush.msra.mxu2 %v1402_v19 }
  0x30   : > { %918 = vmatpush.xpose.msk.msra.mxu1 %vm312_vm1, %v1503_v32  ;;  %937 = vmatpush.xpose.msk.msra.mxu3 %vm312_vm1, %v1503_v32 }
  0x31   : > { %303 = vmatpush.msra.mxu0 %v1409_v20  ;;  %411 = vmatpush.msra.mxu2 %v1409_v20 }
  0x32   : > { %1125 = vset.pattern.permute.xlu0 %v1204_v12  ;;  %612 = vperm.xlu2 %1120, %v1324_v6  }
  0x33   : > { %304 = vmatpush.msra.mxu0 %v1416_v21  ;;  %412 = vmatpush.msra.mxu2 %v1416_v21 }
  0x34   : > { %551 = vperm.xlu0 %1125, %v1380_v16   ;;  %919 = vmatpush.xpose.msk.msra.mxu1 %vm312_vm1, %v1511_v34 }
  0x35   : > { %452 = vmatpush.msrb.mxu0 %v1297_v0  ;;  %951 = vmatpush.xpose.msk.msrb.mxu2 %vm312_vm1, %v1442_v22 }
  0x36   : > { %938 = vmatpush.xpose.msk.msra.mxu3 %vm312_vm1, %v1511_v34  ;;  %1123 = vset.pattern.permute.xlu1 %v1201_v1 }
  0x37   : > { %453 = vmatpush.msrb.mxu0 %v1304_v3  ;;  %441 = vperm.xlu1 %1123, %v1380_v16  }
  0x38   : > { %920 = vmatpush.xpose.msk.msra.mxu1 %vm312_vm1, %v1526_v37 }
  0x39   : > { %454 = vmatpush.msrb.mxu0 %v1312_v4  ;;  %952 = vmatpush.xpose.msk.msrb.mxu2 %vm312_vm1, %v1453_v24 }
  0x3a   : > { %939 = vmatpush.xpose.msk.msra.mxu3 %vm312_vm1, %v1526_v37  ;;  %1122 = vset.pattern.permute.xlu2 %v1209_v52 }
  0x3b   : > { %455 = vmatpush.msrb.mxu0 %v1322_v5  ;;  %722 = vperm.xlu2 %1122, %v1324_v6  }
  0x3c   : > { %921 = vmatpush.xpose.msk.msra.mxu1 %vm312_vm1, %v1540_v38  ;;  %1130 = vset.pattern.permute.xlu0 %v1209_v52 }
  0x3d   : > { %456 = vmatpush.msrb.mxu0 %v1333_v7  ;;  %953 = vmatpush.xpose.msk.msrb.mxu2 %vm312_vm1, %v1466_v26 }
  0x3e   : > { %940 = vmatpush.xpose.msk.msra.mxu3 %vm312_vm1, %v1540_v38 }
  0x3f   : > { %457 = vmatpush.msrb.mxu0 %v1340_v8  ;;  %1126 = vset.pattern.permute.xlu1 %v1206_v35  ;;  %v779_v35 = vld [vmem:[%s1998_s4 + $0x18] sm:$0xff] }
  0x40   : > { %922 = vmatpush.xpose.msk.msra.mxu1 %vm312_vm1, %v1555_v40  ;;  %606 = vperm.xlu1 %1126, %v1380_v16  }
  0x41   : > { %458 = vmatpush.msrb.mxu0 %v1347_v9  ;;  %954 = vmatpush.xpose.msk.msrb.mxu2 %vm312_vm1, %v1479_v29 }
  0x42   : > { %941 = vmatpush.xpose.msk.msra.mxu3 %vm312_vm1, %v1555_v40 }
  0x43   : > { %459 = vmatpush.msrb.mxu0 %v1355_v10  ;;  %1124 = vset.pattern.permute.xlu2 %v1202_v2 }
  0x44   : > { %923 = vmatpush.xpose.msk.msra.mxu1 %vm312_vm1, %v1570_v41  ;;  %496 = vperm.xlu2 %1124, %v1380_v16  }
  0x45   : > { %460 = vmatpush.msrb.mxu0 %v1363_v13  ;;  %955 = vmatpush.xpose.msk.msrb.mxu2 %vm312_vm1, %v1490_v30 }
  0x46   : > { %942 = vmatpush.xpose.msk.msra.mxu3 %vm312_vm1, %v1570_v41 }
  0x47   : > { %461 = vmatpush.msrb.mxu0 %v1371_v14 }
  0x48   : > { %924 = vmatpush.xpose.msk.msra.mxu1 %vm312_vm1, %v1583_v42  ;;  %1128 = vset.pattern.permute.xlu1 %v1207_v36  ;;  %v778_v36 = vld [vmem:[%s1998_s4 + $0x10] sm:$0xff] }
  0x49   : > { %462 = vmatpush.msrb.mxu0 %v1378_v15  ;;  %956 = vmatpush.xpose.msk.msrb.mxu2 %vm312_vm1, %v1503_v32 }
  0x4a   : > { %943 = vmatpush.xpose.msk.msra.mxu3 %vm312_vm1, %v1583_v42  ;;  %716 = vperm.xlu1 %1128, %v1380_v16  }
  0x4b   : > { %463 = vmatpush.msrb.mxu0 %v1387_v17 }
  0x4c   : > { %925 = vmatpush.xpose.msk.msra.mxu1 %vm312_vm1, %v1597_v44  ;;  %1127 = vset.pattern.permute.xlu2 %v1208_v39 }
  0x4d   : > { %464 = vmatpush.msrb.mxu0 %v1394_v18  ;;  %957 = vmatpush.xpose.msk.msrb.mxu2 %vm312_vm1, %v1511_v34 }
  0x4e   : > { %944 = vmatpush.xpose.msk.msra.mxu3 %vm312_vm1, %v1597_v44  ;;  %661 = vperm.xlu2 %1127, %v1380_v16  }
  0x4f   : > { %465 = vmatpush.msrb.mxu0 %v1402_v19 }
  0x50   : > { %926 = vmatpush.xpose.msk.msra.mxu1 %vm312_vm1, %v1611_v45 }
  0x51   : > { %466 = vmatpush.msrb.mxu0 %v1409_v20  ;;  %958 = vmatpush.xpose.msk.msrb.mxu2 %vm312_vm1, %v1526_v37 }
  0x52   : > { %945 = vmatpush.xpose.msk.msra.mxu3 %vm312_vm1, %v1611_v45 }
  0x53   : > { %467 = vmatpush.msrb.mxu0 %v1416_v21 }
  0x54   : > { %927 = vmatpush.xpose.msk.msra.mxu1 %vm312_vm1, %v1626_v46 }
  0x55   : > { %959 = vmatpush.xpose.msk.msrb.mxu2 %vm312_vm1, %v1540_v38 }
  0x56   : > { %946 = vmatpush.xpose.msk.msra.mxu3 %vm312_vm1, %v1626_v46  ;;  %1129 = vset.pattern.permute.xlu2 %v1209_v52 }
  0x57   : > { %771 = vperm.xlu2 %1129, %v1380_v16  }
  0x58   : > { %928 = vmatpush.xpose.msk.msra.mxu1 %vm312_vm1, %v1641_v47 }
  0x59   : > { %960 = vmatpush.xpose.msk.msrb.mxu2 %vm312_vm1, %v1555_v40 }
  0x5a   : > { %947 = vmatpush.xpose.msk.msra.mxu3 %vm312_vm1, %v1641_v47 }
  0x5c   : > { %970 = vmatpush.xpose.msk.msrb.mxu1 %vm312_vm1, %v1442_v22 }
  0x5d   : > { %961 = vmatpush.xpose.msk.msrb.mxu2 %vm312_vm1, %v1570_v41 }
  0x5e   : > { %562 = vmatpush.msrb.mxu3 %v1297_v0 }
  0x60   : > { %971 = vmatpush.xpose.msk.msrb.mxu1 %vm312_vm1, %v1453_v24  ;;  %563 = vmatpush.msrb.mxu3 %v1304_v3 }
  0x61   : > { %962 = vmatpush.xpose.msk.msrb.mxu2 %vm312_vm1, %v1583_v42 }
  0x62   : > { %564 = vmatpush.msrb.mxu3 %v1312_v4 }
  0x64   : > { %972 = vmatpush.xpose.msk.msrb.mxu1 %vm312_vm1, %v1466_v26  ;;  %565 = vmatpush.msrb.mxu3 %v1322_v5 }
  0x65   : > { %963 = vmatpush.xpose.msk.msrb.mxu2 %vm312_vm1, %v1597_v44 }
  0x66   : > { %566 = vmatpush.msrb.mxu3 %v1333_v7 }
  0x68   : > { %973 = vmatpush.xpose.msk.msrb.mxu1 %vm312_vm1, %v1479_v29  ;;  %567 = vmatpush.msrb.mxu3 %v1340_v8 }
  0x69   : > { %964 = vmatpush.xpose.msk.msrb.mxu2 %vm312_vm1, %v1611_v45 }
  0x6a   : > { %568 = vmatpush.msrb.mxu3 %v1347_v9 }
  0x6c   : > { %974 = vmatpush.xpose.msk.msrb.mxu1 %vm312_vm1, %v1490_v30  ;;  %569 = vmatpush.msrb.mxu3 %v1355_v10 }
  0x6d   : > { %965 = vmatpush.xpose.msk.msrb.mxu2 %vm312_vm1, %v1626_v46 }
  0x6e   : > { %570 = vmatpush.msrb.mxu3 %v1363_v13 }
  0x70   : > { %975 = vmatpush.xpose.msk.msrb.mxu1 %vm312_vm1, %v1503_v32  ;;  %571 = vmatpush.msrb.mxu3 %v1371_v14 }
  0x71   : > { %966 = vmatpush.xpose.msk.msrb.mxu2 %vm312_vm1, %v1641_v47 }
  0x72   : > { %572 = vmatpush.msrb.mxu3 %v1378_v15 }
  0x74   : > { %976 = vmatpush.xpose.msk.msrb.mxu1 %vm312_vm1, %v1511_v34  ;;  %573 = vmatpush.msrb.mxu3 %v1387_v17 }
  0x76   : > { %574 = vmatpush.msrb.mxu3 %v1394_v18 }
  0x78   : > { %977 = vmatpush.xpose.msk.msrb.mxu1 %vm312_vm1, %v1526_v37  ;;  %575 = vmatpush.msrb.mxu3 %v1402_v19 }
  0x7a   : > { %576 = vmatpush.msrb.mxu3 %v1409_v20 }
  0x7c   : > { %978 = vmatpush.xpose.msk.msrb.mxu1 %vm312_vm1, %v1540_v38  ;;  %577 = vmatpush.msrb.mxu3 %v1416_v21 }
  0x80   : > { %979 = vmatpush.xpose.msk.msrb.mxu1 %vm312_vm1, %v1555_v40  ;;  %v558_v50 = vpop.permute.xlu2 %557 }
  0x81   : > { %vm559_vm6 = vcmp.eq.s32.totalorder %v1461_v25, %v558_v50 }
  0x84   : > { %980 = vmatpush.xpose.msk.msrb.mxu1 %vm312_vm1, %v1570_v41 }
  0x88   : > { %981 = vmatpush.xpose.msk.msrb.mxu1 %vm312_vm1, %v1583_v42 }
  0x8a   : > { %v393_v27 = vpop.permute.xlu0 %392  ;;  %v448_v33 = vpop.permute.xlu1 %447 }
  0x8b   : > { %vm394_vm2 = vcmp.eq.s32.totalorder %v1461_v25, %v393_v27  ;;  %vm449_vm4 = vcmp.eq.s32.totalorder %v1461_v25, %v448_v33  ;;  %v787_v27 = vld [vmem:[%s1998_s4 + $0x58] sm:$0xff]  ;;  %v781_v33 = vld [vmem:[%s1998_s4 + $0x28] sm:$0xff] }
  0x8c   : > { %931 = vmatmul.msk.f32.vlgmr.msra.gmra.mxu2 %vm394_vm2, %v1205_v28  ;;  %982 = vmatpush.xpose.msk.msrb.mxu1 %vm312_vm1, %v1597_v44  ;;  %v613_v53 = vpop.permute.xlu2 %612  ;;  %vm816_vm2 = vcmp.lt.s32.totalorder %v1461_v25, 16 }
  0x8d   : > { %617 = vmatpush.msra.mxu2 %v1297_v0  ;;  %vm614_vm7 = vcmp.eq.s32.totalorder %v1461_v25, %v613_v53 }
  0x8f   : > { %618 = vmatpush.msra.mxu2 %v1304_v3 }
  0x90   : > { %983 = vmatpush.xpose.msk.msrb.mxu1 %vm312_vm1, %v1611_v45 }
  0x91   : > { %619 = vmatpush.msra.mxu2 %v1312_v4 }
  0x93   : > { %620 = vmatpush.msra.mxu2 %v1322_v5 }
  0x94   : > { %v285_v31 = vpop.permute.xlu0 %284  ;;  %v503_v43 = vpop.permute.xlu1 %502  ;;  %984 = vmatpush.xpose.msk.msrb.mxu1 %vm312_vm1, %v1626_v46 }
  0x95   : > { %vm286_vm3 = vcmp.eq.s32.totalorder %v1461_v25, %v285_v31  ;;  %vm504_vm5 = vcmp.eq.s32.totalorder %v1461_v25, %v503_v43  ;;  %621 = vmatpush.msra.mxu2 %v1333_v7  ;;  %v723_v59 = vpop.permute.xlu2 %722  ;;  %v783_v31 = vld [vmem:[%s1998_s4 + $0x38] sm:$0xff] }
  0x96   : > { %912 = vmatmul.msk.f32.vlgmr.msra.gmra.mxu0 %vm286_vm3, %v1205_v28  ;;  %vm724_vm12 = vcmp.eq.s32.totalorder %v1461_v25, %v723_v59 }
  0x97   : > { %507 = vmatpush.msra.mxu0 %v1297_v0  ;;  %622 = vmatpush.msra.mxu2 %v1340_v8 }
  0x98   : > { %985 = vmatpush.xpose.msk.msrb.mxu1 %vm312_vm1, %v1641_v47 }
  0x99   : > { %508 = vmatpush.msra.mxu0 %v1304_v3  ;;  %623 = vmatpush.msra.mxu2 %v1347_v9 }
  0x9b   : > { %509 = vmatpush.msra.mxu0 %v1312_v4  ;;  %624 = vmatpush.msra.mxu2 %v1355_v10 }
  0x9c   : > { %v388_v60 = vpop.permute.xlu0 %387 }
  0x9d   : > { %510 = vmatpush.msra.mxu0 %v1322_v5  ;;  %625 = vmatpush.msra.mxu2 %v1363_v13  ;;  %vm389_vm10 = vcmp.eq.s32.totalorder %v388_v60, 1 }
  0x9e   : > { %950 = vmatmul.msk.f32.vlgmr.msrb.gmra.mxu0 %vm449_vm4, %v1205_v28 }
  0x9f   : > { %511 = vmatpush.msra.mxu0 %v1333_v7  ;;  %626 = vmatpush.msra.mxu2 %v1371_v14 }
  0xa0   : > { %v668_v55 = vpop.permute.xlu1 %667 }
  0xa1   : > { %512 = vmatpush.msra.mxu0 %v1340_v8  ;;  %627 = vmatpush.msra.mxu2 %v1378_v15  ;;  %vm669_vm8 = vcmp.eq.s32.totalorder %v1461_v25, %v668_v55 }
  0xa3   : > { %513 = vmatpush.msra.mxu0 %v1347_v9  ;;  %628 = vmatpush.msra.mxu2 %v1387_v17 }
  0xa5   : > { %514 = vmatpush.msra.mxu0 %v1355_v10  ;;  %629 = vmatpush.msra.mxu2 %v1394_v18 }
  0xa7   : > { %515 = vmatpush.msra.mxu0 %v1363_v13  ;;  %630 = vmatpush.msra.mxu2 %v1402_v19 }
  0xa9   : > { %516 = vmatpush.msra.mxu0 %v1371_v14  ;;  %631 = vmatpush.msra.mxu2 %v1409_v20  ;;  %v442_v58 = vpop.permute.xlu1 %441 }
  0xaa   : > { %vm443_vm9 = vcmp.eq.s32.totalorder %v442_v58, 1 }
  0xab   : > { %517 = vmatpush.msra.mxu0 %v1378_v15  ;;  %632 = vmatpush.msra.mxu2 %v1416_v21 }
  0xad   : > { %518 = vmatpush.msra.mxu0 %v1387_v17 }
  0xaf   : > { %519 = vmatpush.msra.mxu0 %v1394_v18 }
  0xb1   : > { %520 = vmatpush.msra.mxu0 %v1402_v19 }
  0xb2   : > { %v607_v16 = vpop.permute.xlu1 %606 }
  0xb3   : > { %521 = vmatpush.msra.mxu0 %v1409_v20  ;;  %vm608_vm14 = vcmp.eq.s32.totalorder %v607_v16, 1 }
  0xb5   : > { %522 = vmatpush.msra.mxu0 %v1416_v21 }
  0xb6   : > { %969 = vmatmul.msk.f32.vlgmr.msra.gmra.mxu0 %vm504_vm5, %v1205_v28 }
  0xb7   : > { %989 = vmatpush.xpose.msk.msrb.mxu0 %vm312_vm1, %v1442_v22 }
  0xbb   : > { %990 = vmatpush.xpose.msk.msrb.mxu0 %vm312_vm1, %v1453_v24 }
  0xbc   : > { %v717_v43 = vpop.permute.xlu1 %716 }
  0xbd   : > { %vm718_vm0 = vcmp.eq.s32.totalorder %v717_v43, 1 }
  0xbf   : > { %991 = vmatpush.xpose.msk.msrb.mxu0 %vm312_vm1, %v1466_v26 }
  0xc3   : > { %992 = vmatpush.xpose.msk.msrb.mxu0 %vm312_vm1, %v1479_v29 }
  0xc7   : > { %993 = vmatpush.xpose.msk.msrb.mxu0 %vm312_vm1, %v1490_v30 }
  0xcb   : > { %994 = vmatpush.xpose.msk.msrb.mxu0 %vm312_vm1, %v1503_v32 }
  0xcf   : > { %995 = vmatpush.xpose.msk.msrb.mxu0 %vm312_vm1, %v1511_v34 }
  0xd3   : > { %996 = vmatpush.xpose.msk.msrb.mxu0 %vm312_vm1, %v1526_v37 }
  0xd7   : > { %997 = vmatpush.xpose.msk.msrb.mxu0 %vm312_vm1, %v1540_v38 }
  0xdb   : > { %998 = vmatpush.xpose.msk.msrb.mxu0 %vm312_vm1, %v1555_v40 }
  0xdf   : > { %999 = vmatpush.xpose.msk.msrb.mxu0 %vm312_vm1, %v1570_v41 }
  0xe3   : > { %1000 = vmatpush.xpose.msk.msrb.mxu0 %vm312_vm1, %v1583_v42 }
  0xe7   : > { %1001 = vmatpush.xpose.msk.msrb.mxu0 %vm312_vm1, %v1597_v44 }
  0xeb   : > { %1002 = vmatpush.xpose.msk.msrb.mxu0 %vm312_vm1, %v1611_v45 }
  0xef   : > { %1003 = vmatpush.xpose.msk.msrb.mxu0 %vm312_vm1, %v1626_v46 }
  0xf3   : > { %1004 = vmatpush.xpose.msk.msrb.mxu0 %vm312_vm1, %v1641_v47 }
  0xf7   : > { %727 = vmatpush.msra.mxu0 %v1297_v0 }
  0xf9   : > { %728 = vmatpush.msra.mxu0 %v1304_v3 }
  0xfb   : > { %729 = vmatpush.msra.mxu0 %v1312_v4 }
  0xfd   : > { %730 = vmatpush.msra.mxu0 %v1322_v5 }
  0xff   : > { %731 = vmatpush.msra.mxu0 %v1333_v7 }
 0x101   : > { %732 = vmatpush.msra.mxu0 %v1340_v8 }
 0x103   : > { %733 = vmatpush.msra.mxu0 %v1347_v9 }
 0x105   : > { %734 = vmatpush.msra.mxu0 %v1355_v10 }
 0x107   : > { %735 = vmatpush.msra.mxu0 %v1363_v13 }
 0x109   : > { %736 = vmatpush.msra.mxu0 %v1371_v14 }
 0x10b   : > { %737 = vmatpush.msra.mxu0 %v1378_v15 }
 0x10d   : > { %738 = vmatpush.msra.mxu0 %v1387_v17 }
 0x10f   : > { %739 = vmatpush.msra.mxu0 %v1394_v18  ;;  %v414_v48 = vpop.f32.mrf.mxu2 }
 0x110   : > { %948 = vmatmul.msk.f32.vlgmr.msra.gmra.mxu3 %vm312_vm1, %v414_v48 }
 0x111   : > { %740 = vmatpush.msra.mxu0 %v1402_v19  ;;  %1008 = vmatpush.xpose.msk.msra.mxu3 %vm312_vm1, %v1442_v22 }
 0x113   : > { %741 = vmatpush.msra.mxu0 %v1409_v20  ;;  %v306_v49 = vpop.f32.mrf.mxu0 }
 0x114   : > { %929 = vmatmul.msk.f32.vlgmr.msra.gmra.mxu1 %vm312_vm1, %v306_v49 }
 0x115   : > { %742 = vmatpush.msra.mxu0 %v1416_v21  ;;  %672 = vmatpush.msra.mxu1 %v1297_v0 }
 0x116   : > { %1009 = vmatpush.xpose.msk.msra.mxu3 %vm312_vm1, %v1453_v24 }
 0x117   : > { %673 = vmatpush.msra.mxu1 %v1304_v3 }
 0x118   : > { %988 = vmatmul.msk.f32.vlgmr.msrb.gmra.mxu3 %vm559_vm6, %v1205_v28 }
 0x119   : > { %674 = vmatpush.msra.mxu1 %v1312_v4  ;;  %v497_v4 = vpop.permute.xlu2 %496 }
 0x11a   : > { %1010 = vmatpush.xpose.msk.msra.mxu3 %vm312_vm1, %v1466_v26  ;;  %vm498_vm11 = vcmp.eq.s32.totalorder %v497_v4, 1 }
 0x11b   : > { %v469_v51 = vpop.f32.mrf.mxu0  ;;  %675 = vmatpush.msra.mxu1 %v1322_v5 }
 0x11c   : > { %967 = vmatmul.msk.f32.vlgmr.msrb.gmra.mxu2 %vm312_vm1, %v469_v51 }
 0x11d   : > { %676 = vmatpush.msra.mxu1 %v1333_v7  ;;  %1027 = vmatpush.xpose.msk.msrb.mxu2 %vm312_vm1, %v1442_v22 }
 0x11e   : > { %1011 = vmatpush.xpose.msk.msra.mxu3 %vm312_vm1, %v1479_v29 }
 0x11f   : > { %677 = vmatpush.msra.mxu1 %v1340_v8 }
 0x121   : > { %678 = vmatpush.msra.mxu1 %v1347_v9  ;;  %1028 = vmatpush.xpose.msk.msrb.mxu2 %vm312_vm1, %v1453_v24  ;;  %v662_v39 = vpop.permute.xlu2 %661 }
 0x122   : > { %1012 = vmatpush.xpose.msk.msra.mxu3 %vm312_vm1, %v1490_v30  ;;  %vm663_vm15 = vcmp.eq.s32.totalorder %v662_v39, 1 }
 0x123   : > { %679 = vmatpush.msra.mxu1 %v1355_v10  ;;  %v552_v10 = vpop.permute.xlu0 %551 }
 0x124   : > { %1007 = vmatmul.msk.f32.vlgmr.msra.gmra.mxu2 %vm614_vm7, %v1205_v28  ;;  %vm553_vm13 = vcmp.eq.s32.totalorder %v552_v10, 1 }
 0x125   : > { %680 = vmatpush.msra.mxu1 %v1363_v13  ;;  %1029 = vmatpush.xpose.msk.msrb.mxu2 %vm312_vm1, %v1466_v26 }
 0x126   : > { %1013 = vmatpush.xpose.msk.msra.mxu3 %vm312_vm1, %v1503_v32 }
 0x127   : > { %681 = vmatpush.msra.mxu1 %v1371_v14 }
 0x129   : > { %682 = vmatpush.msra.mxu1 %v1378_v15  ;;  %1030 = vmatpush.xpose.msk.msrb.mxu2 %vm312_vm1, %v1479_v29 }
 0x12a   : > { %1014 = vmatpush.xpose.msk.msra.mxu3 %vm312_vm1, %v1511_v34 }
 0x12b   : > { %683 = vmatpush.msra.mxu1 %v1387_v17 }
 0x12d   : > { %684 = vmatpush.msra.mxu1 %v1394_v18  ;;  %1031 = vmatpush.xpose.msk.msrb.mxu2 %vm312_vm1, %v1490_v30 }
 0x12e   : > { %1015 = vmatpush.xpose.msk.msra.mxu3 %vm312_vm1, %v1526_v37 }
 0x12f   : > { %685 = vmatpush.msra.mxu1 %v1402_v19 }
 0x131   : > { %686 = vmatpush.msra.mxu1 %v1409_v20  ;;  %1032 = vmatpush.xpose.msk.msrb.mxu2 %vm312_vm1, %v1503_v32 }
 0x132   : > { %1016 = vmatpush.xpose.msk.msra.mxu3 %vm312_vm1, %v1540_v38 }
 0x133   : > { %v524_v54 = vpop.f32.mrf.mxu0  ;;  %687 = vmatpush.msra.mxu1 %v1416_v21  ;;  %v791_v21 = vld [vmem:[%s1998_s4 + $0x78] sm:$0xff] }
 0x134   : > { %986 = vmatmul.msk.f32.vlgmr.msrb.gmra.mxu1 %vm312_vm1, %v524_v54  ;;  %v1132_v54 = vld [vmem:[%s1999_s5] ss:$0 sm:$0xff] }
 0x135   : > { %1046 = vmatpush.xpose.msk.msrb.mxu1 %vm312_vm1, %v1442_v22  ;;  %1033 = vmatpush.xpose.msk.msrb.mxu2 %vm312_vm1, %v1511_v34 }
 0x136   : > { %1017 = vmatpush.xpose.msk.msra.mxu3 %vm312_vm1, %v1555_v40 }
 0x139   : > { %1047 = vmatpush.xpose.msk.msrb.mxu1 %vm312_vm1, %v1453_v24  ;;  %1034 = vmatpush.xpose.msk.msrb.mxu2 %vm312_vm1, %v1526_v37  ;;  %v789_v24 = vld [vmem:[%s1998_s4 + $0x68] sm:$0xff] }
 0x13a   : > { %1018 = vmatpush.xpose.msk.msra.mxu3 %vm312_vm1, %v1570_v41 }
 0x13c   : > { %1026 = vmatmul.msk.f32.vlgmr.msra.gmra.mxu1 %vm669_vm8, %v1205_v28 }
 0x13d   : > { %1048 = vmatpush.xpose.msk.msrb.mxu1 %vm312_vm1, %v1466_v26  ;;  %1035 = vmatpush.xpose.msk.msrb.mxu2 %vm312_vm1, %v1540_v38  ;;  %v788_v26 = vld [vmem:[%s1998_s4 + $0x60] sm:$0xff] }
 0x13e   : > { %1019 = vmatpush.xpose.msk.msra.mxu3 %vm312_vm1, %v1583_v42 }
 0x141   : > { %1049 = vmatpush.xpose.msk.msrb.mxu1 %vm312_vm1, %v1479_v29  ;;  %1036 = vmatpush.xpose.msk.msrb.mxu2 %vm312_vm1, %v1555_v40  ;;  %v785_v29 = vld [vmem:[%s1998_s4 + $0x48] sm:$0xff] }
 0x142   : > { %1020 = vmatpush.xpose.msk.msra.mxu3 %vm312_vm1, %v1597_v44 }
 0x145   : > { %1050 = vmatpush.xpose.msk.msrb.mxu1 %vm312_vm1, %v1490_v30  ;;  %1037 = vmatpush.xpose.msk.msrb.mxu2 %vm312_vm1, %v1570_v41  ;;  %v784_v30 = vld [vmem:[%s1998_s4 + $0x40] sm:$0xff] }
 0x146   : > { %1021 = vmatpush.xpose.msk.msra.mxu3 %vm312_vm1, %v1611_v45 }
 0x149   : > { %1051 = vmatpush.xpose.msk.msrb.mxu1 %vm312_vm1, %v1503_v32  ;;  %1038 = vmatpush.xpose.msk.msrb.mxu2 %vm312_vm1, %v1583_v42  ;;  %v782_v32 = vld [vmem:[%s1998_s4 + $0x30] sm:$0xff] }
 0x14a   : > { %1022 = vmatpush.xpose.msk.msra.mxu3 %vm312_vm1, %v1626_v46 }
 0x14d   : > { %1052 = vmatpush.xpose.msk.msrb.mxu1 %vm312_vm1, %v1511_v34  ;;  %1039 = vmatpush.xpose.msk.msrb.mxu2 %vm312_vm1, %v1597_v44  ;;  %v780_v34 = vld [vmem:[%s1998_s4 + $0x20] sm:$0xff] }
 0x14e   : > { %1023 = vmatpush.xpose.msk.msra.mxu3 %vm312_vm1, %v1641_v47 }
 0x151   : > { %1053 = vmatpush.xpose.msk.msrb.mxu1 %vm312_vm1, %v1526_v37  ;;  %1040 = vmatpush.xpose.msk.msrb.mxu2 %vm312_vm1, %v1611_v45  ;;  %v777_v37 = vld [vmem:[%s1998_s4 + $0x8] sm:$0xff] }
 0x152   : > { %796 = vmatpush.xpose.msrb.mxu3 %v791_v21 }
 0x155   : > { %1054 = vmatpush.xpose.msk.msrb.mxu1 %vm312_vm1, %v1540_v38  ;;  %1041 = vmatpush.xpose.msk.msrb.mxu2 %vm312_vm1, %v1626_v46  ;;  %v776_v38 = vld [vmem:[%s1998_s4] sm:$0xff] }
 0x156   : > { %797 = vmatpush.xpose.msrb.mxu3 %v790_v23 }
 0x159   : > { %1055 = vmatpush.xpose.msk.msrb.mxu1 %vm312_vm1, %v1555_v40  ;;  %1042 = vmatpush.xpose.msk.msrb.mxu2 %vm312_vm1, %v1641_v47 }
 0x15a   : > { %798 = vmatpush.xpose.msrb.mxu3 %v789_v24 }
 0x15d   : > { %1056 = vmatpush.xpose.msk.msrb.mxu1 %vm312_vm1, %v1570_v41 }
 0x15e   : > { %799 = vmatpush.xpose.msrb.mxu3 %v788_v26 }
 0x161   : > { %1057 = vmatpush.xpose.msk.msrb.mxu1 %vm312_vm1, %v1583_v42 }
 0x162   : > { %800 = vmatpush.xpose.msrb.mxu3 %v787_v27 }
 0x165   : > { %1058 = vmatpush.xpose.msk.msrb.mxu1 %vm312_vm1, %v1597_v44 }
 0x169   : > { %1059 = vmatpush.xpose.msk.msrb.mxu1 %vm312_vm1, %v1611_v45 }
 0x16d   : > { %1060 = vmatpush.xpose.msk.msrb.mxu1 %vm312_vm1, %v1626_v46  ;;  %v772_v46 = vpop.permute.xlu2 %771 }
 0x171   : > { %1061 = vmatpush.xpose.msk.msrb.mxu1 %vm312_vm1, %v1641_v47 }
 0x191   : > { %v381_v57 = vpop.f32.mrf.mxu1 }
 0x192   : > { %v382_v61 = vadd.f32 %v1894_v56, %v381_v57 }
 0x193   : > { %v437_v62 = vpop.f32.mrf.mxu3 }
 0x194   : > { %v438_v63 = vadd.f32 %v1894_v56, %v437_v62  ;;  %v390_v0 = vsel %vm389_vm10, -inf, %v382_v61 }
 0x196   : > { %v444_v1 = vsel %vm443_vm9, -inf, %v438_v63 }
 0x197   : > { %v445_v2 = vmax.f32 %v390_v0, %v444_v1 }
 0x19b   : > { %v579_v3 = vpop.f32.mrf.mxu3 }
 0x19c   : > { %1005 = vmatmul.msk.f32.vlgmr.msrb.gmra.mxu0 %vm312_vm1, %v579_v3 }
 0x19f   : > { %v492_v5 = vpop.f32.mrf.mxu2 }
 0x1a0   : > { %v493_v6 = vadd.f32 %v1894_v56, %v492_v5 }
 0x1a2   : > { %v499_v7 = vsel %vm498_vm11, -inf, %v493_v6 }
 0x1a3   : > { %v500_v8 = vmax.f32 %v445_v2, %v499_v7 }
 0x1a4   : > { %1045 = vmatmul.msk.f32.vlgmr.msra.gmra.mxu0 %vm724_vm12, %v1205_v28  ;;  %v786_v28 = vld [vmem:[%s1998_s4 + $0x50] sm:$0xff] }
 0x1a5   : > { %801 = vmatpush.xpose.msrb.mxu3 %v786_v28 }
 0x1a7   : > { %v634_v9 = vpop.f32.mrf.mxu2 }
 0x1a8   : > { %1024 = vmatmul.msk.f32.vlgmr.msra.gmra.mxu3 %vm312_vm1, %v634_v9 }
 0x1a9   : > { %802 = vmatpush.xpose.msrb.mxu3 %v785_v29 }
 0x1ad   : > { %803 = vmatpush.xpose.msrb.mxu3 %v784_v30 }
 0x1b1   : > { %v547_v11 = vpop.f32.mrf.mxu1  ;;  %804 = vmatpush.xpose.msrb.mxu3 %v783_v31 }
 0x1b2   : > { %v548_v12 = vadd.f32 %v1894_v56, %v547_v11 }
 0x1b4   : > { %v554_v13 = vsel %vm553_vm13, -inf, %v548_v12 }
 0x1b5   : > { %v555_v14 = vmax.f32 %v500_v8, %v554_v13  ;;  %805 = vmatpush.xpose.msrb.mxu3 %v782_v32 }
 0x1b9   : > { %v689_v15 = vpop.f32.mrf.mxu1  ;;  %806 = vmatpush.xpose.msrb.mxu3 %v781_v33 }
 0x1ba   : > { %1043 = vmatmul.msk.f32.vlgmr.msrb.gmra.mxu2 %vm312_vm1, %v689_v15 }
 0x1bd   : > { %807 = vmatpush.xpose.msrb.mxu3 %v780_v34 }
 0x1c1   : > { %808 = vmatpush.xpose.msrb.mxu3 %v779_v35 }
 0x1c5   : > { %809 = vmatpush.xpose.msrb.mxu3 %v778_v36 }
 0x1c9   : > { %810 = vmatpush.xpose.msrb.mxu3 %v777_v37 }
 0x1cd   : > { %811 = vmatpush.xpose.msrb.mxu3 %v776_v38 }
 0x219   : > { %v602_v17 = vpop.f32.mrf.mxu0 }
 0x21a   : > { %v603_v18 = vadd.f32 %v1894_v56, %v602_v17 }
 0x21c   : > { %v609_v19 = vsel %vm608_vm14, -inf, %v603_v18 }
 0x21d   : > { %v610_v20 = vmax.f32 %v555_v14, %v609_v19 }
 0x221   : > { %v744_v22 = vpop.f32.mrf.mxu0 }
 0x222   : > { %1062 = vmatmul.msk.f32.vlgmr.msrb.gmra.mxu1 %vm312_vm1, %v744_v22  ;;  %vm773_vm1 = vcmp.eq.s32.totalorder %v772_v46, 1 }
 0x22b   : > { %v657_v40 = vpop.f32.mrf.mxu3 }
 0x22c   : > { %v658_v42 = vadd.f32 %v1894_v56, %v657_v40 }
 0x22e   : > { %v664_v45 = vsel %vm663_vm15, -inf, %v658_v42 }
 0x22f   : > { %v665_v48 = vmax.f32 %v610_v20, %v664_v45 }
 0x23d   : > { %v712_v41 = vpop.f32.mrf.mxu2 }
 0x23e   : > { %v713_v44 = vadd.f32 %v1894_v56, %v712_v41 }
 0x240   : > { %v719_v47 = vsel %vm718_vm0, -inf, %v713_v44 }
 0x241   : > { %v720_v51 = vmax.f32 %v665_v48, %v719_v47 }
 0x29f   : > { %v767_v49 = vpop.f32.mrf.mxu1 }
 0x2a0   : > { %v768_v50 = vadd.f32 %v1894_v56, %v767_v49 }
 0x2a2   : > { %v774_v52 = vsel %vm773_vm1, -inf, %v768_v50 }
 0x2a3   : > { %v775_v53 = vmax.f32 %v720_v51, %v774_v52 }
 0x2a5   : > { %812 = vmatmul.f32.vlgmr.msrb.gmra.mxu3 %v775_v53 }
 0x328   : > { %v813_v55 = vpop.f32.mrf.mxu3 }
 0x329   : > { %v814_v57 = vadd.f32 %v1132_v54, %v813_v55 }
 0x32b   : > { %v817_v58 = vsel %vm816_vm2, %v814_v57, -inf }
 0x32c   : > { %818 = vmax.xlane.f32.xlu0 %v817_v58 }
 0x39f   : > { %v819_v59 = vpop.xlane.xlu0 %818 }
 0x3a0   : > { %v820_v60 = vsub.f32 %v817_v58, %v819_v59 }
 0x3a2   : > { %v821_v61 = vmul.f32 1.442695, %v820_v60 }
 0x3a4   : > { %1133 = vpow2.f32 %v821_v61 }
 0x3aa   : > { %v1134_v56 = vpop.eup %1133 }
 0x3ab   : > { %v823_v62 = vsel %vm816_vm2, %v1134_v56, 0.0 }
 0x3ac   : > { %824 = vadd.xlane.f32.xlu1 %v823_v62 }
 0x41f   : > { %v825_v63 = vpop.xlane.xlu1 %824 }
 0x420   : > { %1135 = vlog2.f32 %v825_v63 }
 0x426   : > { %v1136_v25 = vpop.eup %1135 }
 0x427   : > { %v827_v0 = vmul.f32 0.6931472, %v1136_v25 }
 0x429   : > { %v828_v1 = vsub.f32 %v820_v60, %v827_v0 }
 0x42b   : > { %829 = vst [vmem:[%s242_s15] sm:$0xff] %v828_v1 }
 0x42c   : > { %1164 = shalt.err (!%p1161_p3)
}
 0x42d   : > { %1067 = dma.vmem_to_hbm [thread:$0]  (%p1283_p5), %s844_s16, 128, %s846_s17, %s831_s18  }
 0x42e PF: > { %p1073_p4 = scmp.ge.s32.totalorder %s1199_s24, 2  ;;  %s857_s9 = sand.u32 1, %s1187_s21  }
 0x42f   : > { %s858_s11 = scalar_lea.sflag [#allocation3], %s857_s9 }
 0x430   : > { %p1070_p7 = pnand %p1073_p4, %p1287_p6 }
 0x432   : > { %p1071_p8 = pneg %p1070_p7 }
 0x434   : > { %1182 = dma.done.wait (%p1071_p8), %s858_s11, 128  }
 0x435   : > { %1184 = vsyncadd (%p1071_p8), %s858_s11, 4294967168  ;;  %p16_p9 = scmp.ge.s32.totalorder %s1270_s27, 4   ;;  %s2003_s21 = smov %s1191_s22 }
 0x436   : > { %s2004_s22 = smov %s1195_s23  ;;  %s2005_s23 = smov %s1281_s30 }
 0x437   : > { %s2006_s24 = smov %s1270_s27  ;;  %18 = sbr.rel (!%p16_p9) target bundleno = 3 (0x3), region = 79 }
 0x43c   :  { %864 = vsyncpa [#allocation3], 1 }
 0x43d   :  { %866 = vsyncpa [#allocation3 + $0x1], 1 }

</bundles_post_ra>
